<compile_context>
chip_gen: v6e
topology: v6e:2x2x1
jax: 0.10.0
libtpu: 0.0.40
codegen_flags: <defaults>
</compile_context>

<pallas_src>
import functools
import math

import jax
import jax.numpy as jnp
from jax.experimental import pallas as pl
from jax.experimental.pallas import tpu as pltpu

LANE = 128
SUBLANE = 8
VMEM_LIMIT = 48 * 1024 * 1024      # explicit budget, safe on v7x (64 MiB phys)
VMEM_BUDGET = 40 * 1024 * 1024     # what the tile chooser targets


def _round_up(x, m):
    return ((x + m - 1) // m) * m


def _choose_tm(n, dp, a_bytes):
    """Pick target-row tile TM and padded node count so double-buffered
    streamed blocks + resident h/u fit comfortably in VMEM (v7x-safe)."""
    n8 = _round_up(n, SUBLANE)
    cap = max(SUBLANE, n8 // 2)          # keep >= 2 row blocks when possible
    for tm in (256, 128, 64, 32, 16, 8):
        if tm > cap:
            continue
        n_pad = _round_up(n8, tm)
        streamed = 2 * (tm * n_pad * a_bytes + 2 * tm * dp * 4)   # Ahat, raw, out
        resident = 2 * (n_pad * dp * 4 + n_pad * 4 + dp * 4)      # h, u, wb
        if streamed + resident <= VMEM_BUDGET:
            return tm, n_pad
    return SUBLANE, _round_up(n8, SUBLANE)


# ---------------------------------------------------------------------------
# Kernel 1: encoder  h = relu(x @ W1^T + b1), hidden dim padded to 128 lanes
# ---------------------------------------------------------------------------
def _encoder_kernel(x_ref, wt_ref, b_ref, o_ref):
    y = jnp.dot(x_ref[...], wt_ref[...], preferred_element_type=jnp.float32)
    o_ref[...] = jnp.maximum(y + b_ref[...], 0.0)


def encoder(xp, w, b, dp, tm):
    n_pad, f = xp.shape
    d = w.shape[0]
    wt = jnp.zeros((f, dp), jnp.float32).at[:, :d].set(jnp.asarray(w, jnp.float32).T)
    b2 = jnp.zeros((1, dp), jnp.float32).at[0, :d].set(jnp.asarray(b, jnp.float32))
    return pl.pallas_call(
        _encoder_kernel,
        grid=(n_pad // tm,),
        in_specs=[
            pl.BlockSpec((tm, f), lambda i: (i, 0)),      # x row block
            pl.BlockSpec((f, dp), lambda i: (0, 0)),      # W^T, resident
            pl.BlockSpec((1, dp), lambda i: (0, 0)),      # bias, resident
        ],
        out_specs=pl.BlockSpec((tm, dp), lambda i: (i, 0)),   # lane-dense (128)
        out_shape=jax.ShapeDtypeStruct((n_pad, dp), jnp.float32),
        compiler_params=pltpu.CompilerParams(
            dimension_semantics=("parallel",),
            vmem_limit_bytes=VMEM_LIMIT),
    )(xp, wt, b2)


# ---------------------------------------------------------------------------
# Kernel 2: one FALayer + residual, row-tiled over target nodes.
#
# Per target block (TM rows) at grid step i:
#   v[t]    = h[t] . wb                                 (target half of gate)
#   g[t,s]  = tanh(v[t] + u[s])        u[s] = h[s].wa + b   (precomputed, lane axis)
#   w[t,s]  = Ahat[t,s] * g[t,s]       Ahat = A * d_t^-1/2 * d_s^-1/2 (per graph)
#   out[t]  = 0.3*raw[t] + sum_s w[t,s] * h[s]          (MXU, bf16 in / f32 acc)
# ---------------------------------------------------------------------------
def _fa_layer_kernel(ahat_ref, h_ref, raw_ref, u_ref, wb_ref, o_ref, *, mxu_dtype):
    tm = raw_ref.shape[0]
    row0 = pl.multiple_of(pl.program_id(0) * tm, tm)

    h_src = h_ref[...]                                   # (Np, Dp) resident
    h_tgt = h_ref[pl.ds(row0, tm), :]                    # (TM, Dp) target rows

    # target-side gate projection (lane reduction -> XLU)
    v = jnp.sum(h_tgt * wb_ref[...], axis=1, keepdims=True)      # (TM, 1)
    g = jnp.tanh(v + u_ref[...])                                  # (TM, Np) EUP
    w = (ahat_ref[...].astype(jnp.float32) * g).astype(mxu_dtype)  # gated+normalized adj

    agg = jnp.dot(w, h_src.astype(mxu_dtype),
                  preferred_element_type=jnp.float32)             # (TM, Dp)
    o_ref[...] = 0.3 * raw_ref[...] + agg


def fa_layer(ahat, h, raw, gate_w, gate_b, d, dp, tm, mxu_dtype):
    n_pad = h.shape[0]
    gw = jnp.asarray(gate_w, jnp.float32)
    gb = jnp.asarray(gate_b, jnp.float32)
    wa = jnp.zeros((dp, 1), jnp.float32).at[:d, 0].set(gw[0, :d])     # source half
    wb_row = jnp.zeros((1, dp), jnp.float32).at[0, :d].set(gw[0, d:])  # target half

    # Tiny glue: source-side gate projection + bias, laid out on the lane axis.
    u = (h @ wa).T + gb[0]                                           # (1, Np)

    kern = functools.partial(_fa_layer_kernel, mxu_dtype=mxu_dtype)
    return pl.pallas_call(
        kern,
        grid=(n_pad // tm,),
        in_specs=[
            pl.BlockSpec((tm, n_pad), lambda i: (i, 0)),   # Ahat stripe (streamed, bf16)
            pl.BlockSpec((n_pad, dp), lambda i: (0, 0)),   # h, fully resident (DMA'd once)
            pl.BlockSpec((tm, dp), lambda i: (i, 0)),      # raw rows (residual)
            pl.BlockSpec((1, n_pad), lambda i: (0, 0)),    # u, resident
            pl.BlockSpec((1, dp), lambda i: (0, 0)),       # wb, resident
        ],
        out_specs=pl.BlockSpec((tm, dp), lambda i: (i, 0)),   # lane-dense (128)
        out_shape=jax.ShapeDtypeStruct((n_pad, dp), jnp.float32),
        compiler_params=pltpu.CompilerParams(
            dimension_semantics=("parallel",),
            vmem_limit_bytes=VMEM_LIMIT),
    )(ahat, h, raw, u, wb_row)


# ---------------------------------------------------------------------------
# FAGCN forward (head = Identity, eval mode; t2 unused in forward)
# ---------------------------------------------------------------------------
def fagcn_forward(x, A, params, *, use_bf16=True):
    n, f = x.shape
    d = params["t1_w"].shape[0]
    dp = _round_up(d, LANE)
    a_bytes = 2 if use_bf16 else 4
    tm, n_pad = _choose_tm(n, dp, a_bytes)
    mxu_dtype = jnp.bfloat16 if use_bf16 else jnp.float32

    # pad node dimension to a multiple of TM (padded nodes are isolated & zero)
    xp = jnp.zeros((n_pad, f), jnp.float32).at[:n, :].set(jnp.asarray(x, jnp.float32))
    Ap = jnp.zeros((n_pad, n_pad), jnp.float32).at[:n, :n].set(jnp.asarray(A, jnp.float32))

    # degree / symmetric norm: depends only on the graph -> computed ONCE and
    # folded into the adjacency (no per-layer XLU reductions, no AT input).
    deg = jnp.maximum(jnp.sum(Ap, axis=0), 1.0)        # out-degree (source)
    dinv = jax.lax.rsqrt(deg)
    ahat = (Ap * dinv[None, :] * dinv[:, None]).astype(mxu_dtype)

    h = encoder(xp, params["t1_w"], params["t1_b"], dp, tm)
    raw = h
    for gw, gb in params["layers"]:
        h = fa_layer(ahat, h, raw, gw, gb, d, dp, tm, mxu_dtype)
    return h[:n, :d]          # self.head is nn.Identity()


# ---------------------------------------------------------------------------
# Pure-JAX edge-list reference (correctness check only)
# ---------------------------------------------------------------------------
def ref_forward(x, row, col, params):
    N = x.shape[0]
    h = jax.nn.relu(x @ params["t1_w"].T + params["t1_b"])
    raw = h
    deg = jnp.zeros((N,), jnp.float32).at[row].add(1.0)
    dinv = jnp.clip(deg, 1.0, None) ** -0.5
    for gw, gb in params["layers"]:
        h2 = jnp.concatenate([h[row], h[col]], axis=1)
        g = jnp.tanh(h2 @ gw.T + gb)[:, 0]
        norm = g * dinv[row] * dinv[col]
        msg = norm[:, None] * h[row]
        out = jnp.zeros_like(h).at[col].add(msg)
        h = 0.3 * raw + out
    return h


if __name__ == "__main__":
    N = 200           # nodes (not a multiple of the tile -> exercises padding)
    F = 16            # num_features
    D = 32            # out_dim (== num_hidden; t2 is unused in forward)
    LAYERS = 2

    key = jax.random.PRNGKey(0)
    k_x, k_t1w, k_t1b, k_g0, k_g0b, k_g1, k_g1b = jax.random.split(key, 7)

    # deterministic graph: undirected ring + a few long chords
    ar = jnp.arange(N)
    ring_src = jnp.concatenate([ar, (ar + 1) % N])
    ring_dst = jnp.concatenate([(ar + 1) % N, ar])
    c = jnp.arange(0, N // 2, 4)
    chord_src = jnp.concatenate([c, (c + N // 2) % N])
    chord_dst = jnp.concatenate([(c + N // 2) % N, c])
    row = jnp.concatenate([ring_src, chord_src]).astype(jnp.int32)   # sources
    col = jnp.concatenate([ring_dst, chord_dst]).astype(jnp.int32)   # targets
    A = jnp.zeros((N, N), jnp.float32).at[col, row].set(1.0)         # A[t, s]

    # deterministic parameters (xavier_normal, gain=1.414)
    gain = 1.414
    std_t1 = gain * math.sqrt(2.0 / (F + D))
    std_gate = gain * math.sqrt(2.0 / (2 * D + 1))
    params = {
        "t1_w": std_t1 * jax.random.normal(k_t1w, (D, F), jnp.float32),
        "t1_b": 0.1 * jax.random.normal(k_t1b, (D,), jnp.float32),
        "layers": [
            (std_gate * jax.random.normal(k_g0, (1, 2 * D), jnp.float32),
             0.1 * jax.random.normal(k_g0b, (1,), jnp.float32)),
            (std_gate * jax.random.normal(k_g1, (1, 2 * D), jnp.float32),
             0.1 * jax.random.normal(k_g1b, (1,), jnp.float32)),
        ][:LAYERS],
    }
    x = jax.random.normal(k_x, (N, F), jnp.float32)

    ref = ref_forward(x, row, col, params)

    # strict check: pure-f32 kernel path must match the edge-list reference
    out_f32 = jax.block_until_ready(fagcn_forward(x, A, params, use_bf16=False))
    assert out_f32.shape == (N, D)
    assert jnp.allclose(out_f32, ref, atol=1e-3, rtol=1e-3), \
        f"f32 max abs err {jnp.max(jnp.abs(out_f32 - ref))}"

    # optimized path: bf16 adjacency + bf16 matmul operands, f32 accumulation
    out_bf16 = jax.block_until_ready(fagcn_forward(x, A, params, use_bf16=True))
    assert out_bf16.shape == (N, D)
    assert jnp.allclose(out_bf16, ref, atol=3e-2, rtol=3e-2), \
        f"bf16 max abs err {jnp.max(jnp.abs(out_bf16 - ref))}"

    print("KERNEL_OK")
</pallas_src>

<mosaic_0001>
module attributes {stable_mosaic.version = 11 : i64} {
  func.func @_encoder_kernel(%arg0: i32, %arg1: memref<64x16xf32, #tpu.memory_space<vmem>>, %arg2: memref<16x128xf32, #tpu.memory_space<vmem>>, %arg3: memref<1x128xf32, #tpu.memory_space<vmem>>, %arg4: memref<64x128xf32, #tpu.memory_space<vmem>>) attributes {dimension_semantics = [#tpu.dimension_semantics<parallel>], iteration_bounds = array<i64: 4>, scalar_prefetch = 0 : i64, scratch_operands = 0 : i64, tpu.core_type = #tpu.core_type<tc>, window_params = [{transform_indices = @transform_0, window_bounds = array<i64: 64, 16>}, {pipeline_mode = #tpu.pipeline_mode<synchronous>, transform_indices = @transform_1, window_bounds = array<i64: 16, 128>}, {pipeline_mode = #tpu.pipeline_mode<synchronous>, transform_indices = @transform_2, window_bounds = array<i64: 1, 128>}, {transform_indices = @transform_3, window_bounds = array<i64: 64, 128>}]} {
    %c0 = arith.constant 0 : index
    %c0_0 = arith.constant 0 : index
    %0 = vector.load %arg1[%c0, %c0_0] : memref<64x16xf32, #tpu.memory_space<vmem>>, vector<64x16xf32>
    %c0_1 = arith.constant 0 : index
    %c0_2 = arith.constant 0 : index
    %1 = vector.load %arg2[%c0_1, %c0_2] : memref<16x128xf32, #tpu.memory_space<vmem>>, vector<16x128xf32>
    %cst = arith.constant dense<0.000000e+00> : vector<64x128xf32>
    %2 = tpu.matmul %0, %1, %cst {dimension_numbers = #tpu.dot_dimension_numbers<[1], [0], [0], [1], [0, 0, 1, 1], [], []>} : vector<64x16xf32>, vector<16x128xf32>, vector<64x128xf32> -> vector<64x128xf32>
    %c0_3 = arith.constant 0 : index
    %c0_4 = arith.constant 0 : index
    %3 = vector.load %arg3[%c0_3, %c0_4] : memref<1x128xf32, #tpu.memory_space<vmem>>, vector<1x128xf32>
    %4 = vector.broadcast %3 : vector<1x128xf32> to vector<64x128xf32>
    %5 = arith.addf %2, %4 : vector<64x128xf32>
    %cst_5 = arith.constant 0.000000e+00 : f32
    %6 = vector.broadcast %cst_5 : f32 to vector<64x128xf32>
    %7 = arith.maximumf %5, %6 : vector<64x128xf32>
    %c0_6 = arith.constant 0 : index
    %c0_7 = arith.constant 0 : index
    %8 = vector.load %arg4[%c0_6, %c0_7] : memref<64x128xf32, #tpu.memory_space<vmem>>, vector<64x128xf32>
    tpu.vector_store %arg4[%c0_6, %c0_7], %7 {strides = array<i32>} : memref<64x128xf32, #tpu.memory_space<vmem>>, vector<64x128xf32>,
    return
  }
  func.func @transform_0(%arg0: i32) -> (i32, i32) {
    %c0_i32 = arith.constant 0 : i32
    %c0_i32_0 = arith.constant 0 : i32
    return %arg0, %c0_i32 : i32, i32
  }
  func.func @transform_1(%arg0: i32) -> (i32, i32) {
    %c0_i32 = arith.constant 0 : i32
    %c0_i32_0 = arith.constant 0 : i32
    %c0_i32_1 = arith.constant 0 : i32
    return %c0_i32, %c0_i32_0 : i32, i32
  }
  func.func @transform_2(%arg0: i32) -> (i32, i32) {
    %c0_i32 = arith.constant 0 : i32
    %c0_i32_0 = arith.constant 0 : i32
    %c0_i32_1 = arith.constant 0 : i32
    return %c0_i32, %c0_i32_0 : i32, i32
  }
  func.func @transform_3(%arg0: i32) -> (i32, i32) {
    %c0_i32 = arith.constant 0 : i32
    %c0_i32_0 = arith.constant 0 : i32
    return %arg0, %c0_i32 : i32, i32
  }
}

</mosaic_0001>

<bundles_post_ra>
// kernel: tpu_custom_call.1
= control target key start
LH: loop header
LB: loop body
LE: loop exit
PB: predicated region body
PF: predicated region fallthrough
CT: control target
= control target key end

     0   :  { %8 = vsyncpa [#allocation3], 0  ;;  %s711_s0 = inlined_call_operand.vmem [shape: f32[256,16], index: 0, kind: input, shape index: {}]   ;;  %s712_s1 = inlined_call_operand.vmem [shape: f32[16,128], index: 1, kind: input, shape index: {}]   ;;  %s713_s2 = inlined_call_operand.vmem [shape: f32[1,128], index: 2, kind: input, shape index: {}]   ;;  %s714_s3 = inlined_call_operand.hbm [shape: f32[256,128], index: 3, kind: output, shape index: {}]  }
   0x1   :  { %10 = vsyncpa [#allocation3 + $0x1], 0  ;;  %s589_s12 = smov 0   ;;  %s591_s13 = smov 0  }
   0x2   :  { %s593_s14 = smov 0   ;;  %s595_s15 = smov 0  }
   0x3 LB: > { %s610_s16 = sadd.s32 4294967295, %s564_s15   ;;  %s411_s17 = sadd.s32 4294967294, %s564_s15   ;;  %s564_s15 = sphi %s595_s15, %s720_s15   ;;  %s560_s14 = sphi %s593_s14, %s719_s14   ;;  %s556_s13 = sphi %s591_s13, %s718_s13   ;;  %s552_s12 = sphi %s589_s12, %s717_s12  }
   0x4   : > { %s614_s18 = sadd.s32 1, %s564_s15   ;;  %s91_s19 = sadd.s32 1, %s560_s14 }
   0x5   : > { %s88_s20 = ssub.s32 %s564_s15, %s614_s18  ;;  %p101_p0 = scmp.ne.s32.totalorder %s560_s14, %s556_s13 }
   0x6   : > { %p89_p1 = scmp.eq.s32.totalorder %s88_s20, 0  ;;  %p102_p2 = scmp.eq.s32.totalorder %s610_s16, 3 }
   0x7   : > { %p107_p3 = scmp.ne.s32.totalorder %s556_s13, %s552_s12  ;;  %p108_p4 = scmp.eq.s32.totalorder %s411_s17, 3 }
   0x8   : > { %s625_s21 = scalar_select %p89_p1, %s560_s14, %s91_s19  }
   0x9   : > { %p627_p5 = por %p102_p2, %p101_p0  ;;  %p631_p6 = por %p108_p4, %p107_p3 }
   0xa   : > { %p414_p7 = scmp.ge.s32.totalorder %s564_s15, 1  ;;  %p141_p8 = scmp.lt.s32.totalorder %s564_s15, 5 }
   0xc   : > { %p142_p9 = pnand %p414_p7, %p141_p8 }
   0xd   : > { %s416_s28 = sshll.u32 (!%p142_p9), %s610_s16, 3  ;;  %s162_s6 = sand.u32 (!%p142_p9), 1, %s556_s13  }
   0xe   : > { %145 = sbr.rel (%p142_p9) target bundleno = 242 (0xf2), region = 32  ;;  %p166_p10 = scmp.lt.s32.totalorder (!%p142_p9), %s416_s28, 31 }
   0xf   : > { %s415_s9 = sshll.u32 (!%p142_p9), %s162_s6, 6  ;;  %s432_s11 = sshll.u32 (!%p142_p9), %s610_s16, 10 }
  0x10   : > { %s164_s10 = scalar_lea.vmem (!%p142_p9), [#allocation2], %s415_s9  ;;  %s665_s24 = scalar_lea.hbm (!%p142_p9), %s714_s3, %s432_s11 }
  0x11   : > { %s349_s17 = sshll.u32 (!%p142_p9), %s164_s10, 4  ;;  %s671_s16 = scalar_lea.sflag (!%p142_p9), [#allocation3], %s162_s6  ;;  %s667_s17 = int_to_ptr.vmem [resolvable:$true] %s349_s17 }
  0x12   : > { %s504_s25 = scalar_lea.vmem (!%p142_p9), %s667_s17, 1024  ;;  %s566_s26 = smov (!%p142_p9), [#allocation2]  }
  0x13   : > { %v181_v0 = vld [vmem:[%s712_s1 + $0x8] sm:$0xff]  ;;  %v180_v1 = vld [vmem:[%s712_s1] sm:$0xff]  ;;  %s722_s28 = smov (!%p166_p10, %s416_s28), 31  ;;  %vm189_vm0 = vcmask 130048   ;;  %p505_p11 = scmp.ne.s32.totalorder %s667_s17, %s504_s25 }
  0x14   : > { %443 = vmatprep.subr.mxu0 %v181_v0  ;;  %459 = vmatprep.subr.mxu1 %v181_v0  ;;  %s417_s29 = sshll.u32 %s722_s28, 3  ;;  %v418_v10 = vld [vmem:[%s713_s2] ss:$0 sm:$0xff]  ;;  %s508_s27 = sshll.u32 %s566_s26, 4  ;;  %s509_s27 = int_to_ptr.vmem [resolvable:$false] %s508_s27 }
  0x15   : > { %444 = vmatpush3.msra.mxu0 %v181_v0  ;;  %461 = vmatpush3.msra.mxu1 %v181_v0  ;;  %s169_s5 = scalar_lea.vmem %s711_s0, %s417_s29  ;;  %p506_p12 = pnand %p505_p11, %p627_p5 }
  0x16   : > { %445 = vmatprep.subr.mxu0 %v180_v1  ;;  %460 = vmatprep.subr.mxu1 %v180_v1  ;;  %v172_v2 = vld [vmem:[%s169_s5] sm:$0xff]  ;;  %v173_v4 = vld [vmem:[%s169_s5 + $0x8] sm:$0xff]  ;;  %v174_v6 = vld [vmem:[%s169_s5 + $0x10] sm:$0xff]  ;;  %s510_s28 = scalar_lea.vmem %s509_s27, 2048  ;;  %p511_p0 = scmp.lt.s32.totalorder %s667_s17, %s509_s27 }
  0x17   : > { %446 = vmatpush3.msra.mxu0 %v180_v1  ;;  %462 = vmatpush3.msra.mxu1 %v180_v1  ;;  %v176_v3 = vld [vmem:[%s169_s5 + $0x20] sm:$0xff]  ;;  %v177_v5 = vld [vmem:[%s169_s5 + $0x28] sm:$0xff]  ;;  %v178_v7 = vld [vmem:[%s169_s5 + $0x30] sm:$0xff]  ;;  %p507_p13 = pneg %p506_p12  ;;  %p512_p1 = scmp.lt.s32.totalorder %s510_s28, %s504_s25 }
  0x18   : > { %447 = vmatprep.mubr.msk.f32.mxu0 %vm189_vm0, %v172_v2  ;;  %453 = vmatprep.mubr.msk.f32.mxu1 %vm189_vm0, %v176_v3  ;;  %v175_v8 = vld [vmem:[%s169_s5 + $0x18] sm:$0xff] }
  0x19   : > { %448 = vmatmul.mubr.msk.f32.vlgmr.msra.gmra.mxu0 %vm189_vm0, %v173_v4  ;;  %454 = vmatmul.mubr.msk.f32.vlgmr.msra.gmra.mxu1 %vm189_vm0, %v177_v5  ;;  %v179_v9 = vld [vmem:[%s169_s5 + $0x38] sm:$0xff]  ;;  %p513_p2 = por %p512_p1, %p511_p0 }
  0x1a   : > { %450 = vmatprep.mubr.msk.f32.mxu0 %vm189_vm0, %v174_v6  ;;  %456 = vmatprep.mubr.msk.f32.mxu1 %vm189_vm0, %v178_v7 }
  0x1b   : > { %p514_p3 = pnand %p513_p2, %p507_p13 }
  0x1d   : > { %451 = vmatmul.mubr.msk.f32.gmra.mxu0 %vm189_vm0, %v175_v8  ;;  %457 = vmatmul.mubr.msk.f32.gmra.mxu1 %vm189_vm0, %v179_v9 }
  0xd9   : > { %v449_v11 = vpop.f32.mrf.mxu0  ;;  %v455_v12 = vpop.f32.mrf.mxu1 }
  0xda   : > { %v286_v13 = vadd.f32 %v449_v11, %v418_v10  ;;  %v306_v14 = vadd.f32 %v455_v12, %v418_v10 }
  0xdb   : > { %v280_v15 = vpop.f32.mrf.mxu0  ;;  %v300_v16 = vpop.f32.mrf.mxu1 }
  0xdc   : > { %v320_v17 = vmax.f32 %v286_v13, 0.0  ;;  %v324_v18 = vmax.f32 %v306_v14, 0.0  ;;  %v281_v19 = vadd.f32 %v418_v10, %v280_v15  ;;  %v301_v20 = vadd.f32 %v418_v10, %v300_v16 }
  0xdd   : > { %v452_v21 = vpop.f32.mrf.mxu0  ;;  %v458_v22 = vpop.f32.mrf.mxu1 }
  0xde   : > { %328 = vst [vmem:[%s164_s10 + $0x8] sm:$0xff] %v320_v17  ;;  %332 = vst [vmem:[%s164_s10 + $0x28] sm:$0xff] %v324_v18  ;;  %v319_v23 = vmax.f32 %v281_v19, 0.0  ;;  %v323_v24 = vmax.f32 %v301_v20, 0.0  ;;  %v296_v25 = vadd.f32 %v452_v21, %v418_v10  ;;  %v316_v26 = vadd.f32 %v458_v22, %v418_v10 }
  0xdf   : > { %v290_v27 = vpop.f32.mrf.mxu0  ;;  %v310_v28 = vpop.f32.mrf.mxu1 }
  0xe0   : > { %327 = vst [vmem:[%s164_s10] sm:$0xff] %v319_v23  ;;  %331 = vst [vmem:[%s164_s10 + $0x20] sm:$0xff] %v323_v24  ;;  %v322_v29 = vmax.f32 %v296_v25, 0.0  ;;  %v326_v30 = vmax.f32 %v316_v26, 0.0  ;;  %v291_v31 = vadd.f32 %v418_v10, %v290_v27  ;;  %v311_v32 = vadd.f32 %v418_v10, %v310_v28 }
  0xe2   : > { %330 = vst [vmem:[%s164_s10 + $0x18] sm:$0xff] %v322_v29  ;;  %334 = vst [vmem:[%s164_s10 + $0x38] sm:$0xff] %v326_v30  ;;  %v321_v33 = vmax.f32 %v291_v31, 0.0  ;;  %v325_v34 = vmax.f32 %v311_v32, 0.0 }
  0xe4   : > { %329 = vst [vmem:[%s164_s10 + $0x10] sm:$0xff] %v321_v33  ;;  %333 = vst [vmem:[%s164_s10 + $0x30] sm:$0xff] %v325_v34 }
  0xe5   : > { %517 = shalt.err (!%p514_p3)
}
  0xe6   : > { %s518_s29 = scalar_lea.hbm %s665_s24, 1024  ;;  %s522_s5 = scalar_lea.hbm %s714_s3, 4096 }
  0xe7   : > { %p519_p4 = scmp.ne.s32.totalorder %s665_s24, %s518_s29  ;;  %p523_p9 = scmp.lt.s32.totalorder %s665_s24, %s714_s3 }
  0xe8   : > { %p524_p10 = scmp.lt.s32.totalorder %s522_s5, %s518_s29 }
  0xe9   : > { %p520_p7 = pnand %p519_p4, %p627_p5 }
  0xea   : > { %p525_p11 = por %p524_p10, %p523_p9 }
  0xeb   : > { %p521_p8 = pneg %p520_p7 }
  0xed   : > { %p526_p12 = pnand %p525_p11, %p521_p8 }
  0xef   : > { %529 = shalt.err (!%p526_p12)
}
  0xf0   : > { %s567_s8 = smov 128   ;;  %s568_s9 = smov 8  }
  0xf1   : > { %463 = dma.vmem_to_hbm [thread:$0]  (%p627_p5), %s667_s17, 1024, %s665_s24, %s671_s16, %s567_s8, %s567_s8, %s568_s9  }
  0xf2 PF: > { %p469_p13 = scmp.ge.s32.totalorder %s564_s15, 2  ;;  %s364_s10 = sand.u32 1, %s552_s12  }
  0xf3   : > { %s365_s11 = scalar_lea.sflag [#allocation3], %s364_s10 }
  0xf4   : > { %p466_p0 = pnand %p469_p13, %p631_p6 }
  0xf6   : > { %p467_p1 = pneg %p466_p0 }
  0xf8   : > { %547 = dma.done.wait (%p467_p1), %s365_s11, 1024  }
  0xf9   : > { %549 = vsyncadd (%p467_p1), %s365_s11, 4294966272  ;;  %p13_p2 = scmp.ge.s32.totalorder %s614_s18, 6   ;;  %s717_s12 = smov %s556_s13 }
  0xfa   : > { %s718_s13 = smov %s560_s14  ;;  %s719_s14 = smov %s625_s21 }
  0xfb   : > { %s720_s15 = smov %s614_s18  ;;  %15 = sbr.rel (!%p13_p2) target bundleno = 3 (0x3), region = 67 }
 0x100   :  { %370 = vsyncpa [#allocation3], 1 }
 0x101   :  { %372 = vsyncpa [#allocation3 + $0x1], 1 }

</bundles_post_ra>
